<compile_context>
chip_gen: v7x
topology: tpu7x:2x2x1
jax: 0.10.0
libtpu: 0.0.40
codegen_flags: <defaults>
</compile_context>

<pallas_src>
import functools

import jax
import jax.numpy as jnp
from jax.experimental import pallas as pl
from jax.experimental.pallas import tpu as pltpu


_LANE = 128                       # pad last (lane) dims of hidden/output to multiples of this
_SUBLANE = 16                     # round batch-row tiles to this
_VMEM_BUDGET = 24 * 1024 * 1024   # conservative; fits v7x's 32 MiB default scoped VMEM


def _round_up(x, m):
    return (x + m - 1) // m * m


def _qnet_kernel(x_ref, w1_ref, b1_ref, w2_ref, b2_ref, o_ref):
    # x arrives in f32; cast to bf16 in-kernel (VPU slack) instead of paying a
    # separate XLA pass in the wrapper.
    x = x_ref[...].astype(jnp.bfloat16)
    # Layer 1: h = relu(x @ W1 + b1) -- bf16 operands, f32 accumulation (MXU)
    h = jnp.dot(x, w1_ref[...], preferred_element_type=jnp.float32)
    h = jnp.maximum(h + b1_ref[...], 0.0)             # bias + ReLU in f32 (VPU)
    # Layer 2: y = h @ W2 + b2
    y = jnp.dot(h.astype(w2_ref.dtype), w2_ref[...],
                preferred_element_type=jnp.float32)
    o_ref[...] = (y + b2_ref[...]).astype(o_ref.dtype)


def prepare_params(w1, b1, w2, b2):
    """One-time parameter prep (pad to 128 lanes + bf16 cast), hoisted out of
    the per-call forward path.  Weights are stored transposed: (in, out)."""
    in_size, hidden = w1.shape
    out_size = w2.shape[1]
    hid_p = _round_up(hidden, _LANE)
    out_p = _round_up(out_size, _LANE)
    w1_p = jnp.zeros((in_size, hid_p), jnp.bfloat16).at[:, :hidden].set(
        w1.astype(jnp.bfloat16))
    b1_p = jnp.zeros((1, hid_p), jnp.float32).at[:, :hidden].set(
        b1.astype(jnp.float32))
    w2_p = jnp.zeros((hid_p, out_p), jnp.bfloat16).at[:hidden, :out_size].set(
        w2.astype(jnp.bfloat16))
    b2_p = jnp.zeros((1, out_p), jnp.float32).at[:, :out_size].set(
        b2.astype(jnp.float32))
    return (w1_p, b1_p, w2_p, b2_p, out_size)


def _pick_row_tile(B, in_size, hid_p, out_p, row_tile):
    """Even-split batch tiling: >=2 (even) grid steps when the batch is big
    enough (so v7x's 2 TensorCores both get work), no near-empty trailing
    tile, and a tile size that fits a conservative VMEM budget."""
    row_tile = max(_SUBLANE, _round_up(row_tile, _SUBLANE))

    def vmem_est(t):
        return (2 * t * in_size * 4                      # x tiles (f32, double-buffered)
                + 2 * t * out_p * 4                      # out tiles (f32, double-buffered)
                + 2 * (in_size * hid_p + hid_p * out_p) * 2   # weights (bf16, 2 bufs)
                + 2 * (hid_p + out_p) * 4                # biases
                + t * (hid_p + out_p) * 4)               # in-kernel intermediates

    while row_tile > _SUBLANE and vmem_est(row_tile) > _VMEM_BUDGET:
        row_tile = max(_SUBLANE, _round_up(row_tile // 2, _SUBLANE))

    n_tiles = pl.cdiv(B, row_tile)
    if B > _SUBLANE:
        n_tiles = max(2, n_tiles + (n_tiles % 2))        # even step count
    tb = _round_up(pl.cdiv(B, n_tiles), _SUBLANE)
    b_p = tb * pl.cdiv(B, tb)
    return tb, b_p


@functools.partial(jax.jit, static_argnames=("out_size", "row_tile"))
def _forward_padded(x, w1_p, b1_p, w2_p, b2_p, *, out_size, row_tile=256):
    B, in_size = x.shape
    hid_p = w1_p.shape[1]
    out_p = w2_p.shape[1]
    tb, b_p = _pick_row_tile(B, in_size, hid_p, out_p, row_tile)

    # Only x is touched per call: pad batch rows up to the tile grid (kept in
    # f32; the bf16 cast happens inside the kernel).  Padded rows produce
    # garbage that is sliced off below.
    x_p = x if b_p == B else jnp.zeros((b_p, in_size), x.dtype).at[:B].set(x)

    out_padded = pl.pallas_call(
        _qnet_kernel,
        out_shape=jax.ShapeDtypeStruct((b_p, out_p), jnp.float32),
        grid=(b_p // tb,),
        in_specs=[
            pl.BlockSpec((tb, in_size), lambda i: (i, 0)),      # x: tiled over batch
            pl.BlockSpec((in_size, hid_p), lambda i: (0, 0)),   # W1: VMEM-resident
            pl.BlockSpec((1, hid_p), lambda i: (0, 0)),         # b1: VMEM-resident
            pl.BlockSpec((hid_p, out_p), lambda i: (0, 0)),     # W2: VMEM-resident
            pl.BlockSpec((1, out_p), lambda i: (0, 0)),         # b2: VMEM-resident
        ],
        out_specs=pl.BlockSpec((tb, out_p), lambda i: (i, 0)),
        compiler_params=pltpu.CompilerParams(
            dimension_semantics=("parallel",),                  # shard batch steps across TCs
        ),
    )(x_p, w1_p, b1_p, w2_p, b2_p)

    return out_padded[:B, :out_size]


def linear_qnet_forward(x, params, *, row_tile=256):
    """Fused forward pass.  `params` comes from prepare_params()."""
    w1_p, b1_p, w2_p, b2_p, out_size = params
    return _forward_padded(x, w1_p, b1_p, w2_p, b2_p,
                           out_size=out_size, row_tile=row_tile)


def init_params(key, input_size, hidden_size, output_size):
    """Deterministic init mimicking PyTorch nn.Linear's U(-1/sqrt(fan_in), ...)."""
    k1, k2, k3, k4 = jax.random.split(key, 4)
    bound1 = 1.0 / jnp.sqrt(input_size)
    bound2 = 1.0 / jnp.sqrt(hidden_size)
    # Stored transposed relative to PyTorch: (in, out) instead of (out, in).
    w1 = jax.random.uniform(k1, (input_size, hidden_size), jnp.float32, -bound1, bound1)
    b1 = jax.random.uniform(k2, (1, hidden_size), jnp.float32, -bound1, bound1)
    w2 = jax.random.uniform(k3, (hidden_size, output_size), jnp.float32, -bound2, bound2)
    b2 = jax.random.uniform(k4, (1, output_size), jnp.float32, -bound2, bound2)
    return w1, b1, w2, b2


# TODO(synk): Linear_QNet.save() (torch.save checkpoint I/O) is host-side and has
# no kernel equivalent; only the forward pass is implemented here.

if __name__ == "__main__":
    # Small shapes consistent with the module (a Q-network for a game agent).
    batch, input_size, hidden_size, output_size = 2, 16, 32, 4

    key = jax.random.PRNGKey(0)
    kx, kp = jax.random.split(key)
    x = jax.random.normal(kx, (batch, input_size), jnp.float32)
    w1, b1, w2, b2 = init_params(kp, input_size, hidden_size, output_size)

    # One-time parameter prep (hoisted out of the per-call path).
    params = prepare_params(w1, b1, w2, b2)

    out = linear_qnet_forward(x, params)
    out = jax.block_until_ready(out)
    assert out.shape == (batch, output_size)

    # Reference mirroring the kernel's precision (bf16 operands, f32 accumulation).
    def ref_bf16(xa):
        h = jnp.dot(xa.astype(jnp.bfloat16), w1.astype(jnp.bfloat16),
                    preferred_element_type=jnp.float32) + b1
        h = jnp.maximum(h, 0.0)
        return jnp.dot(h.astype(jnp.bfloat16), w2.astype(jnp.bfloat16),
                       preferred_element_type=jnp.float32) + b2

    assert jnp.allclose(out, ref_bf16(x), atol=1e-3, rtol=1e-3)
    # Loose sanity check against the pure-f32 PyTorch-equivalent math.
    ref_f32 = jnp.maximum(x @ w1 + b1, 0.0) @ w2 + b2
    assert jnp.allclose(out, ref_f32, atol=5e-2, rtol=5e-2)

    # Exercise the batched (multi-tile, even-split, parallel-grid) path.
    big_batch = 1000
    xb = jax.random.normal(jax.random.PRNGKey(1), (big_batch, input_size), jnp.float32)
    outb = jax.block_until_ready(linear_qnet_forward(xb, params))
    assert outb.shape == (big_batch, output_size)
    assert jnp.allclose(outb, ref_bf16(xb), atol=1e-3, rtol=1e-3)

    # Mid-size batch that previously wasted a near-empty trailing tile.
    mid_batch = 300
    xm = jax.random.normal(jax.random.PRNGKey(2), (mid_batch, input_size), jnp.float32)
    outm = jax.block_until_ready(linear_qnet_forward(xm, params))
    assert outm.shape == (mid_batch, output_size)
    assert jnp.allclose(outm, ref_bf16(xm), atol=1e-3, rtol=1e-3)

    print("KERNEL_OK")
</pallas_src>

<mosaic_0001>
module attributes {stable_mosaic.version = 11 : i64} {
  func.func @_qnet_kernel(%arg0: i32, %arg1: memref<16x16xf32, #tpu.memory_space<vmem>>, %arg2: memref<16x128xbf16, #tpu.memory_space<vmem>>, %arg3: memref<1x128xf32, #tpu.memory_space<vmem>>, %arg4: memref<128x128xbf16, #tpu.memory_space<vmem>>, %arg5: memref<1x128xf32, #tpu.memory_space<vmem>>, %arg6: memref<16x128xf32, #tpu.memory_space<vmem>>) attributes {dimension_semantics = [#tpu.dimension_semantics<parallel>], iteration_bounds = array<i64: 1>, scalar_prefetch = 0 : i64, scratch_operands = 0 : i64, tpu.core_type = #tpu.core_type<tc>, window_params = [{transform_indices = @transform_0, window_bounds = array<i64: 16, 16>}, {pipeline_mode = #tpu.pipeline_mode<synchronous>, transform_indices = @transform_1, window_bounds = array<i64: 16, 128>}, {pipeline_mode = #tpu.pipeline_mode<synchronous>, transform_indices = @transform_2, window_bounds = array<i64: 1, 128>}, {pipeline_mode = #tpu.pipeline_mode<synchronous>, transform_indices = @transform_3, window_bounds = array<i64: 128, 128>}, {pipeline_mode = #tpu.pipeline_mode<synchronous>, transform_indices = @transform_4, window_bounds = array<i64: 1, 128>}, {transform_indices = @transform_5, window_bounds = array<i64: 16, 128>}]} {
    %c0 = arith.constant 0 : index
    %c0_0 = arith.constant 0 : index
    %0 = vector.load %arg1[%c0, %c0_0] : memref<16x16xf32, #tpu.memory_space<vmem>>, vector<16x16xf32>
    %1 = arith.truncf %0 : vector<16x16xf32> to vector<16x16xbf16>
    %c0_1 = arith.constant 0 : index
    %c0_2 = arith.constant 0 : index
    %2 = vector.load %arg2[%c0_1, %c0_2] : memref<16x128xbf16, #tpu.memory_space<vmem>>, vector<16x128xbf16>
    %cst = arith.constant dense<0.000000e+00> : vector<16x128xf32>
    %3 = tpu.matmul %1, %2, %cst {dimension_numbers = #tpu.dot_dimension_numbers<[1], [0], [0], [1], [0, 0, 1, 1], [], []>} : vector<16x16xbf16>, vector<16x128xbf16>, vector<16x128xf32> -> vector<16x128xf32>
    %c0_3 = arith.constant 0 : index
    %c0_4 = arith.constant 0 : index
    %4 = vector.load %arg3[%c0_3, %c0_4] : memref<1x128xf32, #tpu.memory_space<vmem>>, vector<1x128xf32>
    %5 = vector.broadcast %4 : vector<1x128xf32> to vector<16x128xf32>
    %6 = arith.addf %3, %5 : vector<16x128xf32>
    %cst_5 = arith.constant 0.000000e+00 : f32
    %7 = vector.broadcast %cst_5 : f32 to vector<16x128xf32>
    %8 = arith.maximumf %6, %7 : vector<16x128xf32>
    %9 = arith.truncf %8 : vector<16x128xf32> to vector<16x128xbf16>
    %c0_6 = arith.constant 0 : index
    %c0_7 = arith.constant 0 : index
    %10 = vector.load %arg4[%c0_6, %c0_7] : memref<128x128xbf16, #tpu.memory_space<vmem>>, vector<128x128xbf16>
    %cst_8 = arith.constant dense<0.000000e+00> : vector<16x128xf32>
    %11 = tpu.matmul %9, %10, %cst_8 {dimension_numbers = #tpu.dot_dimension_numbers<[1], [0], [0], [1], [0, 0, 1, 1], [], []>} : vector<16x128xbf16>, vector<128x128xbf16>, vector<16x128xf32> -> vector<16x128xf32>
    %c0_9 = arith.constant 0 : index
    %c0_10 = arith.constant 0 : index
    %12 = vector.load %arg5[%c0_9, %c0_10] : memref<1x128xf32, #tpu.memory_space<vmem>>, vector<1x128xf32>
    %13 = vector.broadcast %12 : vector<1x128xf32> to vector<16x128xf32>
    %14 = arith.addf %11, %13 : vector<16x128xf32>
    %c0_11 = arith.constant 0 : index
    %c0_12 = arith.constant 0 : index
    %15 = vector.load %arg6[%c0_11, %c0_12] : memref<16x128xf32, #tpu.memory_space<vmem>>, vector<16x128xf32>
    tpu.vector_store %arg6[%c0_11, %c0_12], %14 {strides = array<i32>} : memref<16x128xf32, #tpu.memory_space<vmem>>, vector<16x128xf32>,
    return
  }
  func.func @transform_0(%arg0: i32) -> (i32, i32) {
    %c0_i32 = arith.constant 0 : i32
    %c0_i32_0 = arith.constant 0 : i32
    return %arg0, %c0_i32 : i32, i32
  }
  func.func @transform_1(%arg0: i32) -> (i32, i32) {
    %c0_i32 = arith.constant 0 : i32
    %c0_i32_0 = arith.constant 0 : i32
    %c0_i32_1 = arith.constant 0 : i32
    return %c0_i32, %c0_i32_0 : i32, i32
  }
  func.func @transform_2(%arg0: i32) -> (i32, i32) {
    %c0_i32 = arith.constant 0 : i32
    %c0_i32_0 = arith.constant 0 : i32
    %c0_i32_1 = arith.constant 0 : i32
    return %c0_i32, %c0_i32_0 : i32, i32
  }
  func.func @transform_3(%arg0: i32) -> (i32, i32) {
    %c0_i32 = arith.constant 0 : i32
    %c0_i32_0 = arith.constant 0 : i32
    %c0_i32_1 = arith.constant 0 : i32
    return %c0_i32, %c0_i32_0 : i32, i32
  }
  func.func @transform_4(%arg0: i32) -> (i32, i32) {
    %c0_i32 = arith.constant 0 : i32
    %c0_i32_0 = arith.constant 0 : i32
    %c0_i32_1 = arith.constant 0 : i32
    return %c0_i32, %c0_i32_0 : i32, i32
  }
  func.func @transform_5(%arg0: i32) -> (i32, i32) {
    %c0_i32 = arith.constant 0 : i32
    %c0_i32_0 = arith.constant 0 : i32
    return %arg0, %c0_i32 : i32, i32
  }
}

</mosaic_0001>

<bundles_post_ra>
// kernel: _forward_padded.1
= control target key start
LH: loop header
LB: loop body
LE: loop exit
PB: predicated region body
PF: predicated region fallthrough
CT: control target
= control target key end

     0   :  { %10 = vsyncpa [#allocation3], 0  ;;  %s307_s18 = smov [#allocation2]   ;;  %s375_s0 = inlined_call_operand.vmem [shape: f32[16,16], index: 0, kind: input, shape index: {}]   ;;  %s376_s1 = inlined_call_operand.vmem [shape: bf16[16,128], index: 1, kind: input, shape index: {}]   ;;  %s377_s2 = inlined_call_operand.vmem [shape: f32[1,128], index: 2, kind: input, shape index: {}]   ;;  %s378_s3 = inlined_call_operand.hbm [shape: bf16[128,128], index: 3, kind: input, shape index: {}]   ;;  %s379_s4 = inlined_call_operand.vmem [shape: f32[1,128], index: 4, kind: input, shape index: {}]   ;;  %s380_s5 = inlined_call_operand.vmem [shape: f32[16,128], index: 5, kind: output, shape index: {}]  }
   0x1   :  { %s22_s19 = sshll.u32 %s307_s18, 4  ;;  %s283_s22 = scalar_lea.hbm %s378_s3, 1024  ;;  %s23_s19 = int_to_ptr.vmem [resolvable:$true] %s22_s19 }
   0x2   :  { %p284_p0 = scmp.ne.s32.totalorder %s378_s3, %s283_s22  ;;  %p287_p1 = scmp.lt.u32.totalorder %s283_s22, %s378_s3 }
   0x4   :  { %p289_p2 = pnand %p287_p1, %p284_p0 }
   0x6   :  { %292 = shalt.err (!%p289_p2)
}
   0x7   :  { %s293_s27 = scalar_lea.vmem %s23_s19, 1024  ;;  %p298_p4 = scmp.lt.s32.totalorder %s23_s19, %s23_s19 }
   0x8   :  { %p294_p3 = scmp.ne.s32.totalorder %s23_s19, %s293_s27  ;;  %p299_p5 = scmp.lt.s32.totalorder %s293_s27, %s293_s27 }
   0xa   :  { %p300_p6 = por %p299_p5, %p298_p4 }
   0xc   :  { %p301_p7 = pnand %p300_p6, %p294_p3 }
   0xe   :  { %304 = shalt.err (!%p301_p7)
}
   0xf   :  { %s308_s28 = smov 64   ;;  %s309_s29 = smov 4  }
  0x10   :  { %28 = dma.hbm_to_vmem [thread:$0]  %s378_s3, 1024, %s23_s19, [#allocation3], %s308_s28, %s308_s28, %s309_s29  }
  0x11   :  { %305 = dma.done.wait [#allocation3], 1024  }
  0x12   :  { %306 = vsyncadd [#allocation3], 4294966272  ;;  %v310_v0 = vmov 0.0   ;;  %vm311_vm0 = vmmov 0   ;;  %v274_v1 = vld [vmem:[%s376_s1] sm:$0xff]   ;;  %v36_v3 = vld [vmem:[%s375_s0 + $0x8] sm:$0xff] }
  0x13   :  { %243 = vmatprep.subr.bf16.mxu0 %v310_v0  ;;  %245 = vmatprep.mubr.msk.bf16.mxu0 %vm311_vm0, %v310_v0  ;;  %v35_v2 = vld [vmem:[%s375_s0] sm:$0xff]  ;;  %vm53_vm1 = vcmask 130048   ;;  %v276_v6 = vld [vmem:[#allocation2 + $0x8] sm:$0xff]   ;;  %v277_v7 = vld [vmem:[#allocation2 + $0x10] sm:$0xff]  }
  0x14   :  { %249 = vmatprep.subr.bf16.mxu1 %v310_v0  ;;  %265 = vmatprep.mubr.msk.bf16.mxu1 %vm311_vm0, %v310_v0  ;;  %v37_v4 = vpack.c.bf16 %v36_v3, %v35_v2  ;;  %v275_v5 = vld [vmem:[#allocation2] sm:$0xff]   ;;  %v278_v8 = vld [vmem:[#allocation2 + $0x18] sm:$0xff]   ;;  %v280_v10 = vld [vmem:[#allocation2 + $0x28] sm:$0xff]  }
  0x15   :  { %244 = vmatpush3.bf16.msra.mxu0 %v274_v1  ;;  %250 = vmatpush3.bf16.msra.mxu1 %v275_v5  ;;  %v279_v9 = vld [vmem:[#allocation2 + $0x20] sm:$0xff]   ;;  %v281_v11 = vld [vmem:[#allocation2 + $0x30] sm:$0xff]   ;;  %v282_v12 = vld [vmem:[#allocation2 + $0x38] sm:$0xff]  }
  0x16   :  { %251 = vmatprep.subr.bf16.mxu1 %v310_v0  ;;  %v220_v13 = vld [vmem:[%s377_s2] ss:$0 sm:$0xff] }
  0x17   :  { %v223_v23 = vld [vmem:[%s379_s4] ss:$0 sm:$0xff] }
  0x18   :  { %246 = vmatmul.mubr.msk.bf16.vlgmr.msra.gmra.mrb[0].mxu0 %vm53_vm1, %v37_v4 }
  0x19   :  { %252 = vmatpush3.bf16.msra.mxu1 %v276_v6 }
  0x1a   :  { %253 = vmatprep.subr.bf16.mxu1 %v310_v0 }
  0x1d   :  { %254 = vmatpush3.bf16.msra.mxu1 %v277_v7 }
  0x1e   :  { %255 = vmatprep.subr.bf16.mxu1 %v310_v0 }
  0x21   :  { %256 = vmatpush3.bf16.msra.mxu1 %v278_v8 }
  0x22   :  { %257 = vmatprep.subr.bf16.mxu1 %v310_v0 }
  0x25   :  { %258 = vmatpush3.bf16.msra.mxu1 %v279_v9 }
  0x26   :  { %259 = vmatprep.subr.bf16.mxu1 %v310_v0 }
  0x29   :  { %260 = vmatpush3.bf16.msra.mxu1 %v280_v10 }
  0x2a   :  { %261 = vmatprep.subr.bf16.mxu1 %v310_v0 }
  0x2d   :  { %262 = vmatpush3.bf16.msra.mxu1 %v281_v11 }
  0x2e   :  { %263 = vmatprep.subr.bf16.mxu1 %v310_v0 }
  0x31   :  { %264 = vmatpush3.bf16.msra.mxu1 %v282_v12 }
  0xeb   :  { %v91_v14 = vpop.f32.mrb[0].mxu0 }
  0xec   :  { %v92_v15 = vadd.f32 %v220_v13, %v91_v14  ;;  %v247_v16 = vpop.f32.mrb[1].mxu0 }
  0xed   :  { %v94_v17 = vpop.f32.mrb[2].mxu0 }
  0xee   :  { %v95_v18 = vadd.f32 %v220_v13, %v94_v17  ;;  %v248_v19 = vpop.f32.mrb[3].mxu0  ;;  %v98_v20 = vmax.f32 %v92_v15, 0.0 }
  0xf0   :  { %v99_v21 = vmax.f32 %v95_v18, 0.0 }
  0xf2   :  { %v100_v22 = vpack.c.bf16 %v99_v21, %v98_v20 }
  0xf4   :  { %266 = vmatmul.mubr.bf16.vlgmr.msra.gmra.mrb[0].mxu1 %v100_v22 }
 0x1c7   :  { %v206_v24 = vpop.f32.mrb[0].mxu1 }
 0x1c8   :  { %v207_v25 = vadd.f32 %v223_v23, %v206_v24  ;;  %v267_v26 = vpop.f32.mrb[1].mxu1 }
 0x1c9   :  { %v209_v27 = vpop.f32.mrb[2].mxu1 }
 0x1ca   :  { %213 = vst [vmem:[%s380_s5] sm:$0xff] %v207_v25  ;;  %v210_v28 = vadd.f32 %v223_v23, %v209_v27  ;;  %v268_v29 = vpop.f32.mrb[3].mxu1 }
 0x1cc   :  { %214 = vst [vmem:[%s380_s5 + $0x8] sm:$0xff] %v210_v28 }
 0x1cd   :  { %219 = vsyncpa [#allocation3], 1 }

</bundles_post_ra>
